<compile_context>
chip_gen: v6e
topology: v6e:2x2x1
jax: 0.10.0
libtpu: 0.0.40
codegen_flags: <defaults>
</compile_context>

<pallas_src>
import jax
import jax.numpy as jnp
from jax.experimental import pallas as pl
from jax.experimental.pallas import tpu as pltpu


def _gelu_exact(x):
    """Exact GELU: 0.5*x*(1+erf(x/sqrt(2))), erf via A&S 7.1.26 (|err|<1.5e-7)."""
    inv_sqrt2 = 0.7071067811865476
    z = x * inv_sqrt2
    az = jnp.abs(z)
    denom = 1.0 + 0.3275911 * az
    t = pl.reciprocal(denom, approx=True)      # EUP vrcp (off the VALU)
    t = t * (2.0 - denom * t)                  # one Newton step -> ~f32 accuracy
    poly = ((((1.061405429 * t - 1.453152027) * t + 1.421413741) * t
             - 0.284496736) * t + 0.254829592) * t
    erf_abs = 1.0 - poly * jnp.exp(-az * az)
    erf_z = jnp.where(z >= 0.0, erf_abs, -erf_abs)
    return 0.5 * x * (1.0 + erf_z)


def _ffn_kernel_fused(x_ref, w1_ref, b1_ref, w2_ref, b2_ref, o_ref):
    # Single hidden tile: weights resident in VMEM, no accumulator needed.
    h = jnp.dot(x_ref[...], w1_ref[...], preferred_element_type=jnp.float32)
    h = _gelu_exact(h + b1_ref[...])
    out = jnp.dot(h.astype(w2_ref.dtype), w2_ref[...],
                  preferred_element_type=jnp.float32)
    o_ref[...] = (out + b2_ref[...]).astype(o_ref.dtype)


def _ffn_kernel_tiled(x_ref, w1_ref, b1_ref, w2_ref, b2_ref, o_ref, acc_ref):
    # Grid: (row tiles [parallel], hidden tiles [arbitrary / reduction]).
    j = pl.program_id(1)

    @pl.when(j == 0)
    def _init():
        acc_ref[...] = jnp.zeros_like(acc_ref)

    h = jnp.dot(x_ref[...], w1_ref[...], preferred_element_type=jnp.float32)
    h = _gelu_exact(h + b1_ref[...])
    acc_ref[...] += jnp.dot(h.astype(w2_ref.dtype), w2_ref[...],
                            preferred_element_type=jnp.float32)

    @pl.when(j == pl.num_programs(1) - 1)
    def _finalize():
        o_ref[...] = (acc_ref[...] + b2_ref[...]).astype(o_ref.dtype)


def _round_up(a, b):
    return ((a + b - 1) // b) * b


def _physical_vmem_bytes():
    try:
        return int(pltpu.get_tpu_info().vmem_capacity_bytes)
    except Exception:
        return 64 << 20  # conservative default (v7x per-TC VMEM)


def _vmem_estimate(tm, th, dim_p, mm_bytes, out_bytes, tiled):
    est = 2 * tm * dim_p * mm_bytes          # x tiles (double-buffered)
    est += 2 * dim_p * th * mm_bytes         # w1 tile
    est += 2 * th * dim_p * mm_bytes         # w2 tile
    est += 2 * (th + dim_p) * 4              # biases (f32, tiny)
    est += 2 * tm * dim_p * out_bytes        # output tiles
    est += 2 * tm * th * 4                   # hidden activation / GELU temporaries
    if tiled:
        est += tm * dim_p * 4                # f32 accumulator scratch
    return est


def _select_tiles(m, dim_p, hid_p, mm_bytes, out_bytes, budget):
    min_tm = 16 if mm_bytes < 4 else 8       # bf16 packs 16 rows per sublane pair
    m_r = max(_round_up(m, min_tm), min_tm)
    cands = sorted({512, 256, 128, 64, 32, 16, 8} | {min(m_r, 512)}, reverse=True)
    tm_cands = [t for t in cands if min_tm <= t <= m_r and t % min_tm == 0]
    if not tm_cands:
        tm_cands = [min_tm]

    # 1) Prefer a single hidden tile: weights resident, no accumulator RMW.
    for tm in tm_cands:
        if _vmem_estimate(tm, hid_p, dim_p, mm_bytes, out_bytes, False) <= budget:
            return tm, hid_p, min_tm
    # 2) Otherwise tile the hidden (reduction) axis.
    for tm in tm_cands:
        for th in (512, 256, 128):
            if th < hid_p and hid_p % th == 0 and _vmem_estimate(
                    tm, th, dim_p, mm_bytes, out_bytes, True) <= budget:
                return tm, th, min_tm
    # 3) Fallback: smallest tiles.
    return tm_cands[-1], (128 if hid_p > 128 else hid_p), min_tm


def feedforward_forward(x, w1, b1, w2, b2, *, use_bf16_matmul=True):
    """out = GELU(x @ w1 + b1) @ w2 + b2  (Dropout = identity, eval mode)."""
    orig_shape = x.shape
    dim = orig_shape[-1]
    hidden = w1.shape[1]
    assert w1.shape == (dim, hidden) and w2.shape == (hidden, dim)
    assert b1.shape == (hidden,) and b2.shape == (dim,)

    out_dtype = x.dtype
    mm_dtype = jnp.bfloat16 if use_bf16_matmul else jnp.float32
    mm_bytes = 2 if use_bf16_matmul else 4
    out_bytes = jnp.dtype(out_dtype).itemsize

    # Zero-pad lane axes to multiples of 128 (lane-dense stores, full MXU).
    dim_p = _round_up(dim, 128)
    hid_p = _round_up(hidden, 128)

    xr = x.reshape(-1, dim).astype(mm_dtype)
    m = xr.shape[0]
    if dim_p != dim:
        xr = jnp.pad(xr, ((0, 0), (0, dim_p - dim)))
    w1p = jnp.pad(w1, ((0, dim_p - dim), (0, hid_p - hidden))).astype(mm_dtype)
    w2p = jnp.pad(w2, ((0, hid_p - hidden), (0, dim_p - dim))).astype(mm_dtype)
    b1p = jnp.pad(b1, (0, hid_p - hidden)).astype(jnp.float32).reshape(1, hid_p)
    b2p = jnp.pad(b2, (0, dim_p - dim)).astype(jnp.float32).reshape(1, dim_p)

    # VMEM-aware tiling (v5e/v6e: 128 MiB physical, v7x: 64 MiB per TC).
    phys = _physical_vmem_bytes()
    vmem_limit = int(min(max(32 << 20, phys * 3 // 4), 100 << 20))
    budget = int(vmem_limit * 0.85)
    tm, th, min_tm = _select_tiles(m, dim_p, hid_p, mm_bytes, out_bytes, budget)

    m_pad = _round_up(m, tm)
    # Megacore (v7x: 2 TCs): make sure the parallel row axis has >= 2 tiles.
    if m_pad // tm < 2 and _round_up(m, min_tm) >= 2 * min_tm:
        tm = max(min_tm, _round_up(_round_up(m, min_tm) // 2, min_tm))
        m_pad = _round_up(m, tm)
    if m_pad != m:
        xr = jnp.pad(xr, ((0, m_pad - m), (0, 0)))

    grid_i = m_pad // tm
    grid_j = hid_p // th

    if grid_j == 1:
        out = pl.pallas_call(
            _ffn_kernel_fused,
            out_shape=jax.ShapeDtypeStruct((m_pad, dim_p), out_dtype),
            grid=(grid_i,),
            in_specs=[
                pl.BlockSpec((tm, dim_p), lambda i: (i, 0)),      # x row tile
                pl.BlockSpec((dim_p, hid_p), lambda i: (0, 0)),   # w1 (resident)
                pl.BlockSpec((1, hid_p), lambda i: (0, 0)),       # b1 (resident)
                pl.BlockSpec((hid_p, dim_p), lambda i: (0, 0)),   # w2 (resident)
                pl.BlockSpec((1, dim_p), lambda i: (0, 0)),       # b2 (resident)
            ],
            out_specs=pl.BlockSpec((tm, dim_p), lambda i: (i, 0)),
            compiler_params=pltpu.CompilerParams(
                dimension_semantics=("parallel",),
                vmem_limit_bytes=vmem_limit,
            ),
        )(xr, w1p, b1p, w2p, b2p)
    else:
        out = pl.pallas_call(
            _ffn_kernel_tiled,
            out_shape=jax.ShapeDtypeStruct((m_pad, dim_p), out_dtype),
            grid=(grid_i, grid_j),
            in_specs=[
                pl.BlockSpec((tm, dim_p), lambda i, j: (i, 0)),    # x row tile
                pl.BlockSpec((dim_p, th), lambda i, j: (0, j)),    # w1 hidden chunk
                pl.BlockSpec((1, th), lambda i, j: (0, j)),        # b1 hidden chunk
                pl.BlockSpec((th, dim_p), lambda i, j: (j, 0)),    # w2 hidden chunk
                pl.BlockSpec((1, dim_p), lambda i, j: (0, 0)),     # b2 (resident)
            ],
            out_specs=pl.BlockSpec((tm, dim_p), lambda i, j: (i, 0)),
            scratch_shapes=[pltpu.VMEM((tm, dim_p), jnp.float32)],
            compiler_params=pltpu.CompilerParams(
                dimension_semantics=("parallel", "arbitrary"),
                vmem_limit_bytes=vmem_limit,
            ),
        )(xr, w1p, b1p, w2p, b2p)

    out = out[:m, :dim]
    return out.reshape(orig_shape)


def reference_forward(x, w1, b1, w2, b2):
    # Pure-JAX reference mirroring the PyTorch module in eval mode.
    h = jax.nn.gelu(x @ w1 + b1, approximate=False)   # nn.GELU() default = exact erf
    return h @ w2 + b2


if __name__ == "__main__":
    batch, seq, dim, hidden = 2, 8, 32, 64

    key = jax.random.PRNGKey(0)
    kx, k1, kb1, k2, kb2 = jax.random.split(key, 5)

    x = jax.random.normal(kx, (batch, seq, dim), dtype=jnp.float32)
    # Shapes match nn.Linear weights, stored transposed.
    w1 = jax.random.normal(k1, (dim, hidden), dtype=jnp.float32) * (dim ** -0.5)
    b1 = jax.random.normal(kb1, (hidden,), dtype=jnp.float32) * 0.01
    w2 = jax.random.normal(k2, (hidden, dim), dtype=jnp.float32) * (hidden ** -0.5)
    b2 = jax.random.normal(kb2, (dim,), dtype=jnp.float32) * 0.01

    ref = reference_forward(x, w1, b1, w2, b2)

    # Optimized (bf16 MXU) path.
    out_bf16 = jax.block_until_ready(
        feedforward_forward(x, w1, b1, w2, b2, use_bf16_matmul=True))
    assert out_bf16.shape == (batch, seq, dim)
    err_bf16 = float(jnp.max(jnp.abs(out_bf16 - ref)))
    assert err_bf16 < 5e-2, err_bf16

    # Full-precision fallback path.
    out_f32 = jax.block_until_ready(
        feedforward_forward(x, w1, b1, w2, b2, use_bf16_matmul=False))
    err_f32 = float(jnp.max(jnp.abs(out_f32 - ref)))
    assert err_f32 < 2e-3, err_f32

    print("KERNEL_OK")
</pallas_src>

<mosaic_0001>
module attributes {stable_mosaic.version = 11 : i64} {
  func.func @_ffn_kernel_fused(%arg0: i32, %arg1: memref<16x128xbf16, #tpu.memory_space<vmem>>, %arg2: memref<128x128xbf16, #tpu.memory_space<vmem>>, %arg3: memref<1x128xf32, #tpu.memory_space<vmem>>, %arg4: memref<128x128xbf16, #tpu.memory_space<vmem>>, %arg5: memref<1x128xf32, #tpu.memory_space<vmem>>, %arg6: memref<16x128xf32, #tpu.memory_space<vmem>>) attributes {dimension_semantics = [#tpu.dimension_semantics<parallel>], iteration_bounds = array<i64: 1>, scalar_prefetch = 0 : i64, scratch_operands = 0 : i64, tpu.core_type = #tpu.core_type<tc>, window_params = [{transform_indices = @transform_0, window_bounds = array<i64: 16, 128>}, {pipeline_mode = #tpu.pipeline_mode<synchronous>, transform_indices = @transform_1, window_bounds = array<i64: 128, 128>}, {pipeline_mode = #tpu.pipeline_mode<synchronous>, transform_indices = @transform_2, window_bounds = array<i64: 1, 128>}, {pipeline_mode = #tpu.pipeline_mode<synchronous>, transform_indices = @transform_3, window_bounds = array<i64: 128, 128>}, {pipeline_mode = #tpu.pipeline_mode<synchronous>, transform_indices = @transform_4, window_bounds = array<i64: 1, 128>}, {transform_indices = @transform_5, window_bounds = array<i64: 16, 128>}]} {
    %c0 = arith.constant 0 : index
    %c0_0 = arith.constant 0 : index
    %0 = vector.load %arg1[%c0, %c0_0] : memref<16x128xbf16, #tpu.memory_space<vmem>>, vector<16x128xbf16>
    %c0_1 = arith.constant 0 : index
    %c0_2 = arith.constant 0 : index
    %1 = vector.load %arg2[%c0_1, %c0_2] : memref<128x128xbf16, #tpu.memory_space<vmem>>, vector<128x128xbf16>
    %cst = arith.constant dense<0.000000e+00> : vector<16x128xf32>
    %2 = tpu.matmul %0, %1, %cst {dimension_numbers = #tpu.dot_dimension_numbers<[1], [0], [0], [1], [0, 0, 1, 1], [], []>} : vector<16x128xbf16>, vector<128x128xbf16>, vector<16x128xf32> -> vector<16x128xf32>
    %c0_3 = arith.constant 0 : index
    %c0_4 = arith.constant 0 : index
    %3 = vector.load %arg3[%c0_3, %c0_4] : memref<1x128xf32, #tpu.memory_space<vmem>>, vector<1x128xf32>
    %4 = vector.broadcast %3 : vector<1x128xf32> to vector<16x128xf32>
    %5 = arith.addf %2, %4 : vector<16x128xf32>
    %cst_5 = arith.constant 0.707106769 : f32
    %6 = vector.broadcast %cst_5 : f32 to vector<16x128xf32>
    %7 = arith.mulf %5, %6 : vector<16x128xf32>
    %8 = math.absf %7 : vector<16x128xf32>
    %cst_6 = arith.constant 0.327591091 : f32
    %9 = vector.broadcast %cst_6 : f32 to vector<16x128xf32>
    %10 = arith.mulf %9, %8 : vector<16x128xf32>
    %cst_7 = arith.constant 1.000000e+00 : f32
    %11 = vector.broadcast %cst_7 : f32 to vector<16x128xf32>
    %12 = arith.addf %11, %10 : vector<16x128xf32>
    %13 = tpu.reciprocal %12 {approx = true} : vector<16x128xf32> -> vector<16x128xf32>
    %14 = arith.mulf %12, %13 : vector<16x128xf32>
    %cst_8 = arith.constant 2.000000e+00 : f32
    %15 = vector.broadcast %cst_8 : f32 to vector<16x128xf32>
    %16 = arith.subf %15, %14 : vector<16x128xf32>
    %17 = arith.mulf %13, %16 : vector<16x128xf32>
    %cst_9 = arith.constant 1.06140542 : f32
    %18 = vector.broadcast %cst_9 : f32 to vector<16x128xf32>
    %19 = arith.mulf %18, %17 : vector<16x128xf32>
    %cst_10 = arith.constant 1.45315206 : f32
    %20 = vector.broadcast %cst_10 : f32 to vector<16x128xf32>
    %21 = arith.subf %19, %20 : vector<16x128xf32>
    %22 = arith.mulf %21, %17 : vector<16x128xf32>
    %cst_11 = arith.constant 1.42141378 : f32
    %23 = vector.broadcast %cst_11 : f32 to vector<16x128xf32>
    %24 = arith.addf %22, %23 : vector<16x128xf32>
    %25 = arith.mulf %24, %17 : vector<16x128xf32>
    %cst_12 = arith.constant 0.284496725 : f32
    %26 = vector.broadcast %cst_12 : f32 to vector<16x128xf32>
    %27 = arith.subf %25, %26 : vector<16x128xf32>
    %28 = arith.mulf %27, %17 : vector<16x128xf32>
    %cst_13 = arith.constant 0.254829586 : f32
    %29 = vector.broadcast %cst_13 : f32 to vector<16x128xf32>
    %30 = arith.addf %28, %29 : vector<16x128xf32>
    %31 = arith.mulf %30, %17 : vector<16x128xf32>
    %cst_14 = arith.constant 0.000000e+00 : f32
    %32 = vector.broadcast %cst_14 : f32 to vector<16x128xf32>
    %33 = arith.subf %32, %8 : vector<16x128xf32>
    %34 = arith.mulf %33, %8 : vector<16x128xf32>
    %35 = math.exp %34 : vector<16x128xf32>
    %36 = arith.mulf %31, %35 : vector<16x128xf32>
    %cst_15 = arith.constant 1.000000e+00 : f32
    %37 = vector.broadcast %cst_15 : f32 to vector<16x128xf32>
    %38 = arith.subf %37, %36 : vector<16x128xf32>
    %cst_16 = arith.constant 0.000000e+00 : f32
    %39 = vector.broadcast %cst_16 : f32 to vector<16x128xf32>
    %40 = arith.cmpf oge, %7, %39 : vector<16x128xf32>
    %cst_17 = arith.constant 0.000000e+00 : f32
    %41 = vector.broadcast %cst_17 : f32 to vector<16x128xf32>
    %42 = arith.subf %41, %38 : vector<16x128xf32>
    %43 = arith.select %40, %38, %42 : vector<16x128xi1>, vector<16x128xf32>
    %cst_18 = arith.constant 5.000000e-01 : f32
    %44 = vector.broadcast %cst_18 : f32 to vector<16x128xf32>
    %45 = arith.mulf %44, %5 : vector<16x128xf32>
    %cst_19 = arith.constant 1.000000e+00 : f32
    %46 = vector.broadcast %cst_19 : f32 to vector<16x128xf32>
    %47 = arith.addf %46, %43 : vector<16x128xf32>
    %48 = arith.mulf %45, %47 : vector<16x128xf32>
    %49 = arith.truncf %48 : vector<16x128xf32> to vector<16x128xbf16>
    %c0_20 = arith.constant 0 : index
    %c0_21 = arith.constant 0 : index
    %50 = vector.load %arg4[%c0_20, %c0_21] : memref<128x128xbf16, #tpu.memory_space<vmem>>, vector<128x128xbf16>
    %cst_22 = arith.constant dense<0.000000e+00> : vector<16x128xf32>
    %51 = tpu.matmul %49, %50, %cst_22 {dimension_numbers = #tpu.dot_dimension_numbers<[1], [0], [0], [1], [0, 0, 1, 1], [], []>} : vector<16x128xbf16>, vector<128x128xbf16>, vector<16x128xf32> -> vector<16x128xf32>
    %c0_23 = arith.constant 0 : index
    %c0_24 = arith.constant 0 : index
    %52 = vector.load %arg5[%c0_23, %c0_24] : memref<1x128xf32, #tpu.memory_space<vmem>>, vector<1x128xf32>
    %53 = vector.broadcast %52 : vector<1x128xf32> to vector<16x128xf32>
    %54 = arith.addf %51, %53 : vector<16x128xf32>
    %c0_25 = arith.constant 0 : index
    %c0_26 = arith.constant 0 : index
    %55 = vector.load %arg6[%c0_25, %c0_26] : memref<16x128xf32, #tpu.memory_space<vmem>>, vector<16x128xf32>
    tpu.vector_store %arg6[%c0_25, %c0_26], %54 {strides = array<i32>} : memref<16x128xf32, #tpu.memory_space<vmem>>, vector<16x128xf32>,
    return
  }
  func.func @transform_0(%arg0: i32) -> (i32, i32) {
    %c0_i32 = arith.constant 0 : i32
    %c0_i32_0 = arith.constant 0 : i32
    return %arg0, %c0_i32 : i32, i32
  }
  func.func @transform_1(%arg0: i32) -> (i32, i32) {
    %c0_i32 = arith.constant 0 : i32
    %c0_i32_0 = arith.constant 0 : i32
    %c0_i32_1 = arith.constant 0 : i32
    return %c0_i32, %c0_i32_0 : i32, i32
  }
  func.func @transform_2(%arg0: i32) -> (i32, i32) {
    %c0_i32 = arith.constant 0 : i32
    %c0_i32_0 = arith.constant 0 : i32
    %c0_i32_1 = arith.constant 0 : i32
    return %c0_i32, %c0_i32_0 : i32, i32
  }
  func.func @transform_3(%arg0: i32) -> (i32, i32) {
    %c0_i32 = arith.constant 0 : i32
    %c0_i32_0 = arith.constant 0 : i32
    %c0_i32_1 = arith.constant 0 : i32
    return %c0_i32, %c0_i32_0 : i32, i32
  }
  func.func @transform_4(%arg0: i32) -> (i32, i32) {
    %c0_i32 = arith.constant 0 : i32
    %c0_i32_0 = arith.constant 0 : i32
    %c0_i32_1 = arith.constant 0 : i32
    return %c0_i32, %c0_i32_0 : i32, i32
  }
  func.func @transform_5(%arg0: i32) -> (i32, i32) {
    %c0_i32 = arith.constant 0 : i32
    %c0_i32_0 = arith.constant 0 : i32
    return %arg0, %c0_i32 : i32, i32
  }
}

</mosaic_0001>

<bundles_post_ra>
// kernel: tpu_custom_call.1
= control target key start
LH: loop header
LB: loop body
LE: loop exit
PB: predicated region body
PF: predicated region fallthrough
CT: control target
= control target key end

     0   :  { %10 = vsyncpa [#allocation3], 0  ;;  %s638_s0 = inlined_call_operand.hbm [shape: bf16[16,128], index: 0, kind: input, shape index: {}]   ;;  %s639_s1 = inlined_call_operand.hbm [shape: bf16[128,128], index: 1, kind: input, shape index: {}]   ;;  %s640_s2 = inlined_call_operand.vmem [shape: f32[1,128], index: 2, kind: input, shape index: {}]   ;;  %s641_s3 = inlined_call_operand.hbm [shape: bf16[128,128], index: 3, kind: input, shape index: {}]   ;;  %s642_s4 = inlined_call_operand.vmem [shape: f32[1,128], index: 4, kind: input, shape index: {}]   ;;  %s643_s5 = inlined_call_operand.hbm [shape: f32[16,128], index: 5, kind: output, shape index: {}]  }
   0x1   :  { %11 = vsyncpa [#allocation6], 0 }
   0x2   :  { %12 = vsyncpa [#allocation4], 0  ;;  %s576_s18 = smov [#allocation5]   ;;  %s577_s20 = smov [#allocation2]  }
   0x3   :  { %s30_s19 = sshll.u32 %s576_s18, 4  ;;  %s18_s21 = sshll.u32 %s577_s20, 4  ;;  %s31_s19 = int_to_ptr.vmem [resolvable:$true] %s30_s19  ;;  %s19_s21 = int_to_ptr.vmem [resolvable:$true] %s18_s21 }
   0x4   :  { %s498_s22 = scalar_lea.vmem %s31_s19, 1024  ;;  %p503_p1 = scmp.lt.s32.totalorder %s31_s19, %s31_s19 }
   0x5   :  { %p499_p0 = scmp.ne.s32.totalorder %s31_s19, %s498_s22  ;;  %p504_p2 = scmp.lt.s32.totalorder %s498_s22, %s498_s22 }
   0x7   :  { %p505_p3 = por %p504_p2, %p503_p1 }
   0x9   :  { %p506_p4 = pnand %p505_p3, %p499_p0 }
   0xb   :  { %509 = shalt.err (!%p506_p4)
}
   0xc   :  { %s578_s23 = smov 64   ;;  %s579_s24 = smov 4  }
   0xd   :  { %36 = dma.hbm_to_vmem [thread:$0]  %s639_s1, 1024, %s31_s19, [#allocation6], %s578_s23, %s578_s23, %s579_s24  }
   0xe   :  { %s518_s27 = scalar_lea.vmem %s19_s21, 128  ;;  %p523_p6 = scmp.lt.s32.totalorder %s19_s21, %s19_s21 }
   0xf   :  { %p519_p5 = scmp.ne.s32.totalorder %s19_s21, %s518_s27  ;;  %p524_p7 = scmp.lt.s32.totalorder %s518_s27, %s518_s27 }
  0x11   :  { %p525_p8 = por %p524_p7, %p523_p6 }
  0x13   :  { %p526_p9 = pnand %p525_p8, %p519_p5 }
  0x15   :  { %529 = shalt.err (!%p526_p9)
}
  0x16   :  { %24 = dma.hbm_to_vmem [thread:$0]  %s638_s0, 128, %s19_s21, [#allocation3], %s578_s23, %s578_s23, %s579_s24  }
  0x17   :  { %s580_s30 = smov [#allocation7]  }
  0x18   :  { %s44_s6 = sshll.u32 %s580_s30, 4  ;;  %s45_s6 = int_to_ptr.vmem [resolvable:$true] %s44_s6 }
  0x19   :  { %s538_s7 = scalar_lea.vmem %s45_s6, 1024  ;;  %p543_p11 = scmp.lt.s32.totalorder %s45_s6, %s45_s6 }
  0x1a   :  { %p539_p10 = scmp.ne.s32.totalorder %s45_s6, %s538_s7  ;;  %p544_p12 = scmp.lt.s32.totalorder %s538_s7, %s538_s7 }
  0x1c   :  { %p545_p13 = por %p544_p12, %p543_p11 }
  0x1e   :  { %p546_p0 = pnand %p545_p13, %p539_p10 }
  0x20   :  { %549 = shalt.err (!%p546_p0)
}
  0x21   :  { %50 = dma.hbm_to_vmem [thread:$0]  %s641_s3, 1024, %s45_s6, [#allocation6], %s578_s23, %s578_s23, %s579_s24  }
  0x22   :  { %570 = dma.done.wait [#allocation3], 128  }
  0x23   :  { %571 = vsyncadd [#allocation3], 4294967168 }
  0x24   :  { %572 = dma.done.wait [#allocation6], 2048  }
  0x25   :  { %573 = vsyncadd [#allocation6], 4294965248  ;;  %v581_v0 = vmov 0.0   ;;  %vm582_vm0 = vmmov 0   ;;  %v465_v1 = vld [vmem:[#allocation5 + $0x38] sm:$0xff]   ;;  %v466_v2 = vld [vmem:[#allocation5 + $0x30] sm:$0xff]  }
  0x26   :  { %415 = vmatprep.subr.bf16.mxu0 %v581_v0  ;;  %431 = vmatprep.mubr.msk.bf16.mxu0 %vm582_vm0, %v581_v0  ;;  %v467_v3 = vld [vmem:[#allocation5 + $0x28] sm:$0xff]   ;;  %v468_v4 = vld [vmem:[#allocation5 + $0x20] sm:$0xff]   ;;  %v469_v5 = vld [vmem:[#allocation5 + $0x18] sm:$0xff]   ;;  %s583_s10 = smov [#allocation8]  }
  0x27   :  { %435 = vmatprep.subr.bf16.mxu1 %v581_v0  ;;  %451 = vmatprep.mubr.msk.bf16.mxu1 %vm582_vm0, %v581_v0  ;;  %v470_v6 = vld [vmem:[#allocation5 + $0x10] sm:$0xff]   ;;  %v471_v7 = vld [vmem:[#allocation5 + $0x8] sm:$0xff]   ;;  %v472_v8 = vld [vmem:[#allocation5] sm:$0xff]   ;;  %s361_s11 = sshll.u32 %s583_s10, 4  ;;  %s362_s11 = int_to_ptr.vmem [resolvable:$true] %s361_s11 }
  0x28   :  { %416 = vmatpush3.bf16.msra.mxu0 %v465_v1  ;;  %v473_v9 = vld [vmem:[#allocation2] sm:$0xff]   ;;  %v475_v11 = vld [vmem:[#allocation7 + $0x30] sm:$0xff]   ;;  %v476_v12 = vld [vmem:[#allocation7 + $0x28] sm:$0xff]   ;;  %s550_s12 = scalar_lea.vmem %s362_s11, 256  ;;  %p555_p2 = scmp.lt.s32.totalorder %s362_s11, %s362_s11 }
  0x29   :  { %417 = vmatprep.subr.bf16.mxu0 %v581_v0  ;;  %v474_v10 = vld [vmem:[#allocation7 + $0x38] sm:$0xff]   ;;  %v477_v13 = vld [vmem:[#allocation7 + $0x20] sm:$0xff]   ;;  %v479_v15 = vld [vmem:[#allocation7 + $0x10] sm:$0xff]   ;;  %p551_p1 = scmp.ne.s32.totalorder %s362_s11, %s550_s12  ;;  %p556_p3 = scmp.lt.s32.totalorder %s550_s12, %s550_s12 }
  0x2a   :  { %436 = vmatpush3.bf16.msra.mxu1 %v474_v10  ;;  %v478_v14 = vld [vmem:[#allocation7 + $0x18] sm:$0xff]   ;;  %v480_v16 = vld [vmem:[#allocation7 + $0x8] sm:$0xff]   ;;  %v481_v17 = vld [vmem:[#allocation7] sm:$0xff]  }
  0x2b   :  { %437 = vmatprep.subr.bf16.mxu1 %v581_v0  ;;  %v374_v18 = vld [vmem:[%s640_s2] ss:$0 sm:$0xff]  ;;  %p557_p4 = por %p556_p3, %p555_p2 }
  0x2c   :  { %418 = vmatpush3.bf16.msra.mxu0 %v466_v2 }
  0x2d   :  { %419 = vmatprep.subr.bf16.mxu0 %v581_v0  ;;  %p558_p5 = pnand %p557_p4, %p551_p1 }
  0x2e   :  { %438 = vmatpush3.bf16.msra.mxu1 %v475_v11 }
  0x2f   :  { %439 = vmatprep.subr.bf16.mxu1 %v581_v0 }
  0x30   :  { %420 = vmatpush3.bf16.msra.mxu0 %v467_v3 }
  0x31   :  { %421 = vmatprep.subr.bf16.mxu0 %v581_v0 }
  0x32   :  { %440 = vmatpush3.bf16.msra.mxu1 %v476_v12 }
  0x33   :  { %441 = vmatprep.subr.bf16.mxu1 %v581_v0 }
  0x34   :  { %422 = vmatpush3.bf16.msra.mxu0 %v468_v4 }
  0x35   :  { %423 = vmatprep.subr.bf16.mxu0 %v581_v0 }
  0x36   :  { %442 = vmatpush3.bf16.msra.mxu1 %v477_v13 }
  0x37   :  { %443 = vmatprep.subr.bf16.mxu1 %v581_v0 }
  0x38   :  { %424 = vmatpush3.bf16.msra.mxu0 %v469_v5 }
  0x39   :  { %425 = vmatprep.subr.bf16.mxu0 %v581_v0 }
  0x3a   :  { %444 = vmatpush3.bf16.msra.mxu1 %v478_v14 }
  0x3b   :  { %445 = vmatprep.subr.bf16.mxu1 %v581_v0 }
  0x3c   :  { %426 = vmatpush3.bf16.msra.mxu0 %v470_v6 }
  0x3d   :  { %427 = vmatprep.subr.bf16.mxu0 %v581_v0 }
  0x3e   :  { %446 = vmatpush3.bf16.msra.mxu1 %v479_v15 }
  0x3f   :  { %447 = vmatprep.subr.bf16.mxu1 %v581_v0 }
  0x40   :  { %428 = vmatpush3.bf16.msra.mxu0 %v471_v7 }
  0x41   :  { %429 = vmatprep.subr.bf16.mxu0 %v581_v0 }
  0x42   :  { %448 = vmatpush3.bf16.msra.mxu1 %v480_v16 }
  0x43   :  { %449 = vmatprep.subr.bf16.mxu1 %v581_v0 }
  0x44   :  { %430 = vmatpush3.bf16.msra.mxu0 %v472_v8 }
  0x46   :  { %450 = vmatpush3.bf16.msra.mxu1 %v481_v17 }
  0x47   :  { %432 = vmatmul.mubr.bf16.vlgmr.msra.gmra.mxu0 %v473_v9 }
 0x107   :  { %v176_v19 = vpop.f32.mrf.mxu0 }
 0x108   :  { %v628_v20 = vadd.f32 %v374_v18, %v176_v19 }
 0x109   :  { %v433_v21 = vpop.f32.mrf.mxu0 }
 0x10a   :  { %v183_v22 = vmul.f32 0.70710677, %v628_v20  ;;  %v235_v12 = vmul.f32 0.5, %v628_v20 }
 0x10b   :  { %v179_v23 = vpop.f32.mrf.mxu0 }
 0x10c   :  { %v185_v24 = vand.u32 2147483647, %v183_v22  ;;  %v180_v25 = vadd.f32 %v374_v18, %v179_v23  ;;  %vm229_vm1 = vcmp.ge.f32.partialorder %v183_v22, 0.0  ;;  %v388_v18 = vld [vmem:[%s642_s4] ss:$0 sm:$0xff] }
 0x10d   :  { %v434_v26 = vpop.f32.mrf.mxu0 }
 0x10e   :  { %v187_v27 = vmul.f32 0.3275911, %v185_v24  ;;  %v184_v28 = vmul.f32 0.70710677, %v180_v25  ;;  %v217_v33 = vsub.f32 0.0, %v185_v24  ;;  %v236_v13 = vmul.f32 0.5, %v180_v25 }
 0x110   :  { %v189_v29 = vadd.f32 1.0, %v187_v27  ;;  %v186_v30 = vand.u32 2147483647, %v184_v28  ;;  %v219_v37 = vmul.f32 %v217_v33, %v185_v24  ;;  %vm230_vm2 = vcmp.ge.f32.partialorder %v184_v28, 0.0 }
 0x112   :  { %482 = vrcp.f32 %v189_v29  ;;  %v188_v31 = vmul.f32 0.3275911, %v186_v30  ;;  %v218_v38 = vsub.f32 0.0, %v186_v30  ;;  %v221_v43 = vmul.f32 1.442695, %v219_v37 }
 0x114   :  { %v190_v32 = vadd.f32 1.0, %v188_v31  ;;  %v220_v45 = vmul.f32 %v218_v38, %v186_v30 }
 0x116   :  { %484 = vrcp.f32 %v190_v32  ;;  %v223_v50 = vmul.f32 1.442695, %v220_v45 }
 0x117   :  { %486 = vpow2.f32 %v221_v43 }
 0x118   :  { %488 = vpow2.f32 %v223_v50 }
 0x11f   :  { %v483_v34 = vpop.eup %482 }
 0x120   :  { %v193_v35 = vmul.f32 %v483_v34, %v189_v29 }
 0x122   :  { %v195_v36 = vsub.f32 2.0, %v193_v35 }
 0x123   :  { %v485_v39 = vpop.eup %484 }
 0x124   :  { %v197_v40 = vmul.f32 %v483_v34, %v195_v36  ;;  %v194_v41 = vmul.f32 %v485_v39, %v190_v32  ;;  %v487_v63 = vpop.eup %486 }
 0x125   :  { %v489_v4 = vpop.eup %488 }
 0x126   :  { %v199_v42 = vmul.f32 1.0614054, %v197_v40  ;;  %v196_v44 = vsub.f32 2.0, %v194_v41 }
 0x128   :  { %v384_v46 = vadd.f32 -1.4531521, %v199_v42  ;;  %v198_v47 = vmul.f32 %v485_v39, %v196_v44 }
 0x12a   :  { %v203_v48 = vmul.f32 %v384_v46, %v197_v40  ;;  %v200_v49 = vmul.f32 1.0614054, %v198_v47 }
 0x12c   :  { %v205_v51 = vadd.f32 1.4214138, %v203_v48  ;;  %v385_v52 = vadd.f32 -1.4531521, %v200_v49 }
 0x12e   :  { %v207_v53 = vmul.f32 %v205_v51, %v197_v40  ;;  %v204_v54 = vmul.f32 %v385_v52, %v198_v47 }
 0x130   :  { %v386_v55 = vadd.f32 -0.28449672, %v207_v53  ;;  %v206_v56 = vadd.f32 1.4214138, %v204_v54 }
 0x132   :  { %v211_v57 = vmul.f32 %v386_v55, %v197_v40  ;;  %v208_v58 = vmul.f32 %v206_v56, %v198_v47 }
 0x134   :  { %v213_v59 = vadd.f32 0.2548296, %v211_v57  ;;  %v387_v60 = vadd.f32 -0.28449672, %v208_v58 }
 0x136   :  { %v215_v61 = vmul.f32 %v213_v59, %v197_v40  ;;  %v212_v62 = vmul.f32 %v387_v60, %v198_v47 }
 0x138   :  { %v225_v0 = vmul.f32 %v487_v63, %v215_v61  ;;  %v214_v1 = vadd.f32 0.2548296, %v212_v62 }
 0x13a   :  { %v227_v2 = vsub.f32 1.0, %v225_v0  ;;  %v216_v3 = vmul.f32 %v214_v1, %v198_v47 }
 0x13c   :  { %v231_v5 = vsub.f32 0.0, %v227_v2  ;;  %v226_v6 = vmul.f32 %v489_v4, %v216_v3 }
 0x13e   :  { %v233_v7 = vsel %vm229_vm1, %v227_v2, %v231_v5  ;;  %v228_v8 = vsub.f32 1.0, %v226_v6 }
 0x13f   :  { %v237_v10 = vadd.f32 1.0, %v233_v7 }
 0x140   :  { %v232_v9 = vsub.f32 0.0, %v228_v8 }
 0x141   :  { %v239_v15 = vmul.f32 %v237_v10, %v235_v12 }
 0x142   :  { %v234_v11 = vsel %vm230_vm2, %v228_v8, %v232_v9 }
 0x143   :  { %v238_v14 = vadd.f32 1.0, %v234_v11 }
 0x145   :  { %v240_v16 = vmul.f32 %v238_v14, %v236_v13 }
 0x147   :  { %v241_v17 = vpack.c.bf16 %v240_v16, %v239_v15 }
 0x149   :  { %452 = vmatmul.mubr.bf16.vlgmr.msra.gmra.mxu1 %v241_v17 }
 0x209   :  { %v347_v19 = vpop.f32.mrf.mxu1 }
 0x20a   :  { %v348_v21 = vadd.f32 %v388_v18, %v347_v19 }
 0x20b   :  { %v453_v22 = vpop.f32.mrf.mxu1 }
 0x20c   :  { %354 = vst [vmem:[#allocation8] sm:$0xff] %v348_v21 }
 0x20d   :  { %v350_v23 = vpop.f32.mrf.mxu1 }
 0x20e   :  { %v351_v24 = vadd.f32 %v388_v18, %v350_v23 }
 0x20f   :  { %v454_v20 = vpop.f32.mrf.mxu1 }
 0x210   :  { %355 = vst [vmem:[#allocation8 + $0x8] sm:$0xff] %v351_v24 }
 0x211   :  { %561 = shalt.err (!%p558_p5)
}
 0x212   :  { %s584_s13 = smov 128   ;;  %s585_s4 = smov 8  }
 0x213   :  { %367 = dma.vmem_to_hbm [thread:$0]  %s362_s11, 256, %s643_s5, [#allocation4], %s584_s13, %s584_s13, %s585_s4  }
 0x214   :  { %574 = dma.done.wait [#allocation4], 256  }
 0x215   :  { %575 = vsyncadd [#allocation4], 4294967040 }
 0x216   :  { %371 = vsyncpa [#allocation3], 1 }
 0x217   :  { %372 = vsyncpa [#allocation6], 1 }
 0x218   :  { %373 = vsyncpa [#allocation4], 1 }

</bundles_post_ra>
